<compile_context>
chip_gen: v6e
topology: v6e:2x2x1
jax: 0.10.0
libtpu: 0.0.40
codegen_flags: <defaults>
</compile_context>

<pallas_src>
from functools import partial

import jax
import jax.numpy as jnp
from jax.experimental import pallas as pl
from jax.experimental.pallas import tpu as pltpu


def _conv1x1_nchw_kernel(x_ref, wt_ref, b_ref, o_ref, *, nb):
    # x_ref:  [Nb, C_in, TS]  bf16, one packed batch group, one spatial tile
    # wt_ref: [C_out, C_in]   bf16, VMEM-resident across the whole grid
    # b_ref:  [C_out, 1]      f32, added on the f32 accumulator
    # o_ref:  [Nb, C_out, TS] lane-dense output (TS multiple of 128)
    w = wt_ref[...]
    bias = b_ref[...]
    for i in range(nb):  # nb is a static Python int -> unrolled
        acc = jnp.dot(w, x_ref[i], preferred_element_type=jnp.float32)
        o_ref[i] = (acc + bias).astype(o_ref.dtype)


def conv1x1_pallas(x_nchw, w_oc, b, *, out_dtype=jnp.bfloat16,
                   storage_dtype=jnp.bfloat16):
    """1x1 Conv2d + bias, NCHW in / NCHW out.

    x_nchw: [N, C_in, H, W], w_oc: [C_out, C_in], b: [C_out].
    bf16 storage / f32 accumulation on every TPU generation.
    """
    N, C, H, W = x_nchw.shape
    Cout = w_oc.shape[0]
    HW = H * W

    # bf16 is a storage/transfer dtype only; all arithmetic on f32 accumulator.
    x3d = x_nchw.reshape(N, C, HW).astype(storage_dtype)   # reshape only, no transpose
    w2d = w_oc.astype(storage_dtype)
    b2d = b.reshape(Cout, 1).astype(jnp.float32)

    x_item = jnp.dtype(storage_dtype).itemsize
    o_item = jnp.dtype(out_dtype).itemsize

    # Small-C batch packing: aim for Nb*C ~ 8 sublanes per block.
    nb = max(1, 8 // max(C, 1))
    nb = min(nb, N)
    while N % nb != 0:
        nb -= 1

    # Generation-aware VMEM budget (v7x = 64 MiB is the smallest; v5e/v6e = 128 MiB).
    try:
        phys_vmem = int(pltpu.get_tpu_info().vmem_capacity_bytes)
    except Exception:
        phys_vmem = 64 * 1024 * 1024
    budget = int(phys_vmem * 0.70)
    vmem_limit = int(phys_vmem * 0.75)

    # Double-buffered weight+bias copies (constant index_map still gets 2 bufs).
    # TODO(synk): pipeline_mode=pl.Buffered(1) on the weight/bias specs would
    # drop this to one copy when Cout*C is large; negligible for 1x1 convs here.
    const_bytes = 2 * (Cout * C * x_item + Cout * 4)
    per_ts = 2 * nb * (C * x_item + Cout * o_item)   # double-buffered x + out blocks
    ts_max = max(0, (budget - const_bytes) // per_ts)
    TS = min(HW, (ts_max // 128) * 128)
    if TS < 128:
        TS = min(HW, 128)  # extreme channel counts; may exceed budget (compile-time error, not silent)

    grid = (N // nb, pl.cdiv(HW, TS))  # ragged last spatial block is masked by Pallas

    cost = pl.CostEstimate(
        flops=2 * N * HW * C * Cout,
        transcendentals=0,
        bytes_accessed=N * HW * (C * x_item + Cout * o_item) + Cout * C * x_item + Cout * 4,
    )

    out3d = pl.pallas_call(
        partial(_conv1x1_nchw_kernel, nb=nb),
        out_shape=jax.ShapeDtypeStruct((N, Cout, HW), out_dtype),
        grid=grid,
        in_specs=[
            pl.BlockSpec((nb, C, TS), lambda n, s: (n, 0, s)),
            pl.BlockSpec((Cout, C), lambda n, s: (0, 0)),
            pl.BlockSpec((Cout, 1), lambda n, s: (0, 0)),
        ],
        out_specs=pl.BlockSpec((nb, Cout, TS), lambda n, s: (n, 0, s)),
        compiler_params=pltpu.CompilerParams(
            dimension_semantics=("parallel", "parallel"),
            vmem_limit_bytes=vmem_limit,
        ),
        cost_estimate=cost,
    )(x3d, w2d, b2d)

    return out3d.reshape(N, Cout, H, W)  # reshape only, no transpose


class InnerConvModule:
    """Stand-in for the wrapped torch module: Conv2d(C_in, C_out, kernel_size=1)."""

    def __init__(self, c_in, c_out, key):
        kw, kb = jax.random.split(key)
        # f32 master weights; forward casts to bf16 storage (f32 accumulation).
        self.w = jax.random.normal(kw, (c_out, c_in), jnp.float32) / jnp.sqrt(c_in)
        self.b = jax.random.normal(kb, (c_out,), jnp.float32) * 0.01

    def __call__(self, x_nchw):
        return conv1x1_pallas(x_nchw, self.w, self.b)


class LocalDDP:
    """Exact semantics of the PyTorch LocalDDP: pure delegation to self.module."""

    def __init__(self, module):
        self.module = module

    def __call__(self, *args, **kwargs):
        return self.module(*args, **kwargs)


if __name__ == "__main__":
    key = jax.random.PRNGKey(0)
    kx, kp = jax.random.split(key)

    N, C_in, H, W = 2, 4, 16, 16
    C_out = 8
    x = jax.random.normal(kx, (N, C_in, H, W), jnp.float32)

    model = LocalDDP(InnerConvModule(C_in, C_out, kp))
    out = jax.block_until_ready(model(x))

    # Reference: same bf16-storage / f32-accumulation recipe, pure JAX.
    xb = x.astype(jnp.bfloat16).astype(jnp.float32)
    wb = model.module.w.astype(jnp.bfloat16).astype(jnp.float32)
    ref = jnp.einsum("nchw,oc->nohw", xb, wb) + model.module.b[None, :, None, None]

    assert out.shape == (N, C_out, H, W), out.shape
    assert out.dtype == jnp.bfloat16, out.dtype
    err = float(jnp.max(jnp.abs(out.astype(jnp.float32) - ref)))
    assert err < 5e-2, err  # bf16 output rounding only (inputs match the ref bit-exactly)

    print("KERNEL_OK")
</pallas_src>

<mosaic_0001>
module attributes {stable_mosaic.version = 11 : i64} {
  func.func @_conv1x1_nchw_kernel(%arg0: i32, %arg1: i32, %arg2: memref<2x4x256xbf16, #tpu.memory_space<vmem>>, %arg3: memref<8x4xbf16, #tpu.memory_space<vmem>>, %arg4: memref<8x1xf32, #tpu.memory_space<vmem>>, %arg5: memref<2x8x256xbf16, #tpu.memory_space<vmem>>) attributes {dimension_semantics = [#tpu.dimension_semantics<parallel>, #tpu.dimension_semantics<parallel>], iteration_bounds = array<i64: 1, 1>, scalar_prefetch = 0 : i64, scratch_operands = 0 : i64, tpu.core_type = #tpu.core_type<tc>, window_params = [{transform_indices = @transform_0, window_bounds = array<i64: 2, 4, 256>}, {pipeline_mode = #tpu.pipeline_mode<synchronous>, transform_indices = @transform_1, window_bounds = array<i64: 8, 4>}, {pipeline_mode = #tpu.pipeline_mode<synchronous>, transform_indices = @transform_2, window_bounds = array<i64: 8, 1>}, {transform_indices = @transform_3, window_bounds = array<i64: 2, 8, 256>}]} {
    %c0 = arith.constant 0 : index
    %c0_0 = arith.constant 0 : index
    %0 = vector.load %arg3[%c0, %c0_0] : memref<8x4xbf16, #tpu.memory_space<vmem>>, vector<8x4xbf16>
    %c0_1 = arith.constant 0 : index
    %c0_2 = arith.constant 0 : index
    %1 = vector.load %arg4[%c0_1, %c0_2] : memref<8x1xf32, #tpu.memory_space<vmem>>, vector<8x1xf32>
    %c0_3 = arith.constant 0 : index
    %c0_4 = arith.constant 0 : index
    %c0_5 = arith.constant 0 : index
    %2 = vector.load %arg2[%c0_3, %c0_4, %c0_5] : memref<2x4x256xbf16, #tpu.memory_space<vmem>>, vector<1x4x256xbf16>
    %3 = vector.shape_cast %2 : vector<1x4x256xbf16> to vector<4x256xbf16>
    %cst = arith.constant dense<0.000000e+00> : vector<8x256xf32>
    %4 = tpu.matmul %0, %3, %cst {dimension_numbers = #tpu.dot_dimension_numbers<[1], [0], [0], [1], [0, 0, 1, 1], [], []>} : vector<8x4xbf16>, vector<4x256xbf16>, vector<8x256xf32> -> vector<8x256xf32>
    %5 = vector.broadcast %1 : vector<8x1xf32> to vector<8x256xf32>
    %6 = arith.addf %4, %5 : vector<8x256xf32>
    %7 = arith.truncf %6 : vector<8x256xf32> to vector<8x256xbf16>
    %c0_6 = arith.constant 0 : index
    %c0_7 = arith.constant 0 : index
    %c0_8 = arith.constant 0 : index
    %8 = vector.load %arg5[%c0_6, %c0_7, %c0_8] : memref<2x8x256xbf16, #tpu.memory_space<vmem>>, vector<1x8x256xbf16>
    %9 = vector.shape_cast %8 : vector<1x8x256xbf16> to vector<8x256xbf16>
    %10 = vector.shape_cast %7 : vector<8x256xbf16> to vector<1x8x256xbf16>
    tpu.vector_store %arg5[%c0_6, %c0_7, %c0_8], %10 {strides = array<i32>} : memref<2x8x256xbf16, #tpu.memory_space<vmem>>, vector<1x8x256xbf16>,
    %c1 = arith.constant 1 : index
    %c0_9 = arith.constant 0 : index
    %c0_10 = arith.constant 0 : index
    %11 = vector.load %arg2[%c1, %c0_9, %c0_10] : memref<2x4x256xbf16, #tpu.memory_space<vmem>>, vector<1x4x256xbf16>
    %12 = vector.shape_cast %11 : vector<1x4x256xbf16> to vector<4x256xbf16>
    %cst_11 = arith.constant dense<0.000000e+00> : vector<8x256xf32>
    %13 = tpu.matmul %0, %12, %cst_11 {dimension_numbers = #tpu.dot_dimension_numbers<[1], [0], [0], [1], [0, 0, 1, 1], [], []>} : vector<8x4xbf16>, vector<4x256xbf16>, vector<8x256xf32> -> vector<8x256xf32>
    %14 = vector.broadcast %1 : vector<8x1xf32> to vector<8x256xf32>
    %15 = arith.addf %13, %14 : vector<8x256xf32>
    %16 = arith.truncf %15 : vector<8x256xf32> to vector<8x256xbf16>
    %c1_12 = arith.constant 1 : index
    %c0_13 = arith.constant 0 : index
    %c0_14 = arith.constant 0 : index
    %17 = vector.load %arg5[%c1_12, %c0_13, %c0_14] : memref<2x8x256xbf16, #tpu.memory_space<vmem>>, vector<1x8x256xbf16>
    %18 = vector.shape_cast %17 : vector<1x8x256xbf16> to vector<8x256xbf16>
    %19 = vector.shape_cast %16 : vector<8x256xbf16> to vector<1x8x256xbf16>
    tpu.vector_store %arg5[%c1_12, %c0_13, %c0_14], %19 {strides = array<i32>} : memref<2x8x256xbf16, #tpu.memory_space<vmem>>, vector<1x8x256xbf16>,
    return
  }
  func.func @transform_0(%arg0: i32, %arg1: i32) -> (i32, i32, i32) {
    %c0_i32 = arith.constant 0 : i32
    %c0_i32_0 = arith.constant 0 : i32
    return %arg0, %c0_i32, %arg1 : i32, i32, i32
  }
  func.func @transform_1(%arg0: i32, %arg1: i32) -> (i32, i32) {
    %c0_i32 = arith.constant 0 : i32
    %c0_i32_0 = arith.constant 0 : i32
    %c0_i32_1 = arith.constant 0 : i32
    return %c0_i32, %c0_i32_0 : i32, i32
  }
  func.func @transform_2(%arg0: i32, %arg1: i32) -> (i32, i32) {
    %c0_i32 = arith.constant 0 : i32
    %c0_i32_0 = arith.constant 0 : i32
    %c0_i32_1 = arith.constant 0 : i32
    return %c0_i32, %c0_i32_0 : i32, i32
  }
  func.func @transform_3(%arg0: i32, %arg1: i32) -> (i32, i32, i32) {
    %c0_i32 = arith.constant 0 : i32
    %c0_i32_0 = arith.constant 0 : i32
    return %arg0, %c0_i32, %arg1 : i32, i32, i32
  }
}

</mosaic_0001>

<bundles_post_ra>
// kernel: tpu_custom_call.1
= control target key start
LH: loop header
LB: loop body
LE: loop exit
PB: predicated region body
PF: predicated region fallthrough
CT: control target
= control target key end

     0   :  { %vm37_vm0 = vcmask 1041408   ;;  %v216_v4 = vmov 0   ;;  %s255_s0 = inlined_call_operand.vmem [shape: bf16[2,4,256], index: 0, kind: input, shape index: {}]   ;;  %s256_s1 = inlined_call_operand.vmem [shape: bf16[8,4], index: 1, kind: input, shape index: {}]   ;;  %s257_s2 = inlined_call_operand.vmem [shape: f32[8,1], index: 2, kind: input, shape index: {}]   ;;  %s258_s3 = inlined_call_operand.hbm [shape: bf16[2,8,256], index: 3, kind: output, shape index: {}]  }
   0x1   :  { %v178_v0 = vld.sshfl [vmem:[%s255_s0] sm:$0x33 pattern:$0x76325410]  ;;  %76 = vmatprep.mubr.bf16.mxu0 %v216_v4  ;;  %143 = vmatprep.mubr.bf16.mxu1 %v216_v4 }
   0x2   :  { %v32_v1 = vcombine.high %v178_v0, %v178_v0  ;;  %v183_v2 = vld.sshfl [vmem:[%s255_s0 + $0x4] sm:$0x33 pattern:$0x76325410]  ;;  %v39_v3 = vsel %vm37_vm0, %v178_v0, 0  ;;  %193 = vset.pattern.permute.xlu0 %v216_v4 }
   0x3   :  { %v104_v5 = vcombine.high %v183_v2, %v183_v2  ;;  %v106_v6 = vsel %vm37_vm0, %v183_v2, 0  ;;  %v17_v7 = vld [vmem:[%s257_s2] sm:$0xff] }
   0x4   :  { %8 = vsyncpa [#allocation3], 0  ;;  %179 = vmatprep.subr.msk.bf16.mxu0 %vm37_vm0, %v32_v1  ;;  %21 = vperm.xlu0 %193, %v17_v7   ;;  %v16_v8 = vld [vmem:[%s256_s1] sm:$0xf]  ;;  %vm33_vm1 = vcmask 31744   ;;  %s217_s0 = smov [#allocation2]  }
   0x5   :  { %184 = vmatprep.subr.msk.bf16.mxu1 %vm37_vm0, %v104_v5  ;;  %59 = vmatpush1.bf16.msra.mxu0 %v39_v3  ;;  %s167_s20 = sshll.u32 %s217_s0, 4  ;;  %s168_s20 = int_to_ptr.vmem [resolvable:$true] %s167_s20 }
   0x6   :  { %126 = vmatpush1.bf16.msra.mxu1 %v106_v6  ;;  %s194_s1 = scalar_lea.vmem %s168_s20, 256  ;;  %p199_p1 = scmp.lt.s32.totalorder %s168_s20, %s168_s20 }
   0x7   :  { %p195_p0 = scmp.ne.s32.totalorder %s168_s20, %s194_s1  ;;  %p200_p2 = scmp.lt.s32.totalorder %s194_s1, %s194_s1 }
   0x8   :  { %180 = vmatmul.mubr.msk.bf16.vlgmr.msra.gmra.mxu0 %vm33_vm1, %v16_v8 }
   0x9   :  { %185 = vmatmul.mubr.msk.bf16.vlgmr.msra.gmra.mxu1 %vm33_vm1, %v16_v8  ;;  %p201_p3 = por %p200_p2, %p199_p1 }
   0xb   :  { %p202_p4 = pnand %p201_p3, %p195_p0 }
  0x7f   :  { %v22_v9 = vpop.permute.xlu0 %21 }
  0xc8   :  { %v78_v10 = vpop.f32.mrf.mxu0 }
  0xc9   :  { %v145_v11 = vpop.f32.mrf.mxu1  ;;  %v79_v13 = vadd.f32 %v78_v10, %v22_v9 }
  0xca   :  { %v80_v12 = vpop.f32.mrf.mxu0  ;;  %v146_v16 = vadd.f32 %v145_v11, %v22_v9 }
  0xcb   :  { %v81_v14 = vadd.f32 %v80_v12, %v22_v9  ;;  %v147_v15 = vpop.f32.mrf.mxu1 }
  0xcc   :  { %v148_v17 = vadd.f32 %v147_v15, %v22_v9  ;;  %v82_v18 = vpop.f32.mrf.mxu0 }
  0xcd   :  { %v187_v19 = vpack.c.bf16 %v81_v14, %v79_v13  ;;  %v149_v20 = vpop.f32.mrf.mxu1 }
  0xce   :  { %v188_v21 = vpack.c.bf16 %v148_v17, %v146_v16  ;;  %v83_v22 = vpop.f32.mrf.mxu0 }
  0xcf   :  { %93 = vst [vmem:[#allocation2] sm:$0xff] %v187_v19  ;;  %v150_v23 = vpop.f32.mrf.mxu1 }
  0xd0   :  { %161 = vst [vmem:[#allocation2 + $0x8] sm:$0xff] %v188_v21 }
  0xd1   :  { %205 = shalt.err (!%p202_p4)
}
  0xd2   :  { %s218_s2 = smov 128   ;;  %s219_s21 = smov 8  }
  0xd3   :  { %173 = dma.vmem_to_hbm [thread:$0]  %s168_s20, 256, %s258_s3, [#allocation3], %s218_s2, %s218_s2, %s219_s21  }
  0xd4   :  { %214 = dma.done.wait [#allocation3], 256  }
  0xd5   :  { %215 = vsyncadd [#allocation3], 4294967040 }
  0xd6   :  { %177 = vsyncpa [#allocation3], 1 }

</bundles_post_ra>
